<compile_context>
chip_gen: v7x
topology: tpu7x:2x2x1
jax: 0.10.0
libtpu: 0.0.40
codegen_flags: <defaults>
</compile_context>

<pallas_src>
import jax
import jax.numpy as jnp
from jax import lax
from jax.experimental import pallas as pl
from jax.experimental.pallas import tpu as pltpu
import numpy as np


def _make_structure_kernel(stacked):
    """Build the kernel body.  `stacked=True`: teacher+student rows are stacked
    into a single (2G, tD) MXU operand (only when 2G <= 8, purely to fill the
    8 MXU sublanes); otherwise two separate G x G Grams are accumulated."""

    def kernel(t_state_ref, s_state_ref, t_hid_ref, s_hid_ref,
               new_t_ref, new_s_ref, dist_ref, cos_ref, *acc_refs):
        G = t_state_ref.shape[1]          # num_batch_group (block holds full G)
        k = pl.program_id(1)
        k_last = pl.num_programs(1) - 1

        @pl.when(k == 0)
        def _():
            for acc in acc_refs:
                acc[...] = jnp.zeros_like(acc)

        # ---- fused sliding-window state update for this D tile -------------
        # drop oldest group, append the new batch-mean centroid.  Assembled as
        # values and written with ONE full-width store per output ref (no
        # scratch round-trip, no sublane-masked partial stores).
        t_cent = jnp.mean(t_hid_ref[0].astype(jnp.float32), axis=0, keepdims=True)
        s_cent = jnp.mean(s_hid_ref[0].astype(jnp.float32), axis=0, keepdims=True)
        t_new = jnp.concatenate(
            [t_state_ref[0, pl.ds(1, G - 1), :].astype(jnp.float32), t_cent],
            axis=0)                                               # (G, tD)
        s_new = jnp.concatenate(
            [s_state_ref[0, pl.ds(1, G - 1), :].astype(jnp.float32), s_cent],
            axis=0)                                               # (G, tD)
        new_t_ref[0] = t_new.astype(new_t_ref.dtype)
        new_s_ref[0] = s_new.astype(new_s_ref.dtype)

        # ---- Gram accumulation over D tiles (MXU) ---------------------------
        dims = (((1,), (1,)), ((), ()))
        if stacked:
            x = jnp.concatenate([t_new, s_new], axis=0)           # (2G, tD)
            acc_refs[0][...] += lax.dot_general(
                x, x, dims, precision=lax.Precision.HIGHEST,
                preferred_element_type=jnp.float32)               # (2G, 2G)
        else:
            acc_refs[0][...] += lax.dot_general(
                t_new, t_new, dims, precision=lax.Precision.HIGHEST,
                preferred_element_type=jnp.float32)               # (G, G)
            acc_refs[1][...] += lax.dot_general(
                s_new, s_new, dims, precision=lax.Precision.HIGHEST,
                preferred_element_type=jnp.float32)               # (G, G)

        # ---- epilogue: structure matrices + per-layer squared-error sums ----
        @pl.when(k == k_last)
        def _():
            if stacked:
                gram = acc_refs[0][...]                           # (2G, 2G)
                g_t = gram[0:G, 0:G]
                g_s = gram[G:2 * G, G:2 * G]
            else:
                g_t = acc_refs[0][...]
                g_s = acc_refs[1][...]

            def structure(g):
                rr = lax.broadcasted_iota(jnp.int32, (G, G), 0)
                cc = lax.broadcasted_iota(jnp.int32, (G, G), 1)
                diag = jnp.where(rr == cc, g, 0.0)
                sq_col = jnp.sum(diag, axis=1, keepdims=True)     # (G,1) = |x_i|^2
                sq_row = jnp.sum(diag, axis=0, keepdims=True)     # (1,G)
                # cdist2: sqrt(clamp(|x|^2 + |y|^2 - 2 x.y, 0) + 1e-8)
                sq_dist = jnp.maximum(sq_col + sq_row - 2.0 * g, 0.0)
                eucl = jnp.sqrt(sq_dist + 1e-8)
                # cosine from the Gram: g / (max(|x_i|,eps) * max(|x_j|,eps))
                inv_col = 1.0 / jnp.maximum(jnp.sqrt(sq_col), 1e-12)
                inv_row = 1.0 / jnp.maximum(jnp.sqrt(sq_row), 1e-12)
                cos = g * inv_col * inv_row
                return eucl, cos

            t_eucl, t_cos = structure(g_t)
            s_eucl, s_cos = structure(g_s)
            d_e = t_eucl - s_eucl
            d_c = t_cos - s_cos
            dist_ref[...] = jnp.full(dist_ref.shape, jnp.sum(d_e * d_e), jnp.float32)
            cos_ref[...] = jnp.full(cos_ref.shape, jnp.sum(d_c * d_c), jnp.float32)

    return kernel


def _vmem_plan():
    """Generation-aware (limit, budget) in bytes.  128 MiB parts (v5e/v6e) get
    a ~96 MiB scoped limit (raises v5e's 16 MiB default); 64 MiB parts (v7x)
    get ~48 MiB.  Budget leaves headroom for compiler-internal scratch."""
    phys = 64 * 1024 * 1024          # conservative default (v7x-sized VMEM)
    try:
        info = pltpu.get_tpu_info()
        phys = int(getattr(info, "vmem_capacity_bytes", phys) or phys)
    except Exception:
        pass
    vmem_limit = min(int(phys * 3 // 4), 100 * 1024 * 1024)
    budget = max(vmem_limit - (6 << 20), 8 * 1024 * 1024)
    return vmem_limit, budget


def _choose_block_d(D, G, B, cap=32768, vmem_budget=None):
    """Largest D tile that is a multiple of 128, divides D, and keeps the
    double-buffered in/out blocks inside the scoped VMEM budget.
    Per-step footprint ~= (8G + 4B) * block_d * 4 bytes (2x-buffered blocks)."""
    if vmem_budget is None:
        vmem_budget = 40 * 1024 * 1024
    if D % 128 != 0:
        return D                      # wrapper pads D to a multiple of 128
    bd = 128
    while True:
        nxt = bd * 2
        if nxt > cap or nxt > D or D % nxt != 0:
            break
        per_step = (8 * G + 4 * B) * nxt * 4
        if per_step > vmem_budget:
            break
        bd = nxt
    return bd


def external_structure_pallas(t_state, s_state, t_hidden, s_hidden, block_d=None):
    """t_state/s_state: (L-1, G, D) float32; t_hidden/s_hidden: (L-1, B, D).
    Returns (distance_mse, cosine_mse, new_teacher_state, new_student_state)."""
    Lm1, G, D = t_state.shape
    _, B, _ = t_hidden.shape

    # zero-pad D to a multiple of 128 (exact for centroids / Grams / norms)
    pad = (-D) % 128
    Dp = D + pad
    if pad:
        zpad = ((0, 0), (0, 0), (0, pad))
        t_state = jnp.pad(t_state, zpad)
        s_state = jnp.pad(s_state, zpad)
        t_hidden = jnp.pad(t_hidden, zpad)
        s_hidden = jnp.pad(s_hidden, zpad)

    vmem_limit, vmem_budget = _vmem_plan()
    if block_d is None:
        block_d = _choose_block_d(Dp, G, B, vmem_budget=vmem_budget)
    assert Dp % block_d == 0
    Kt = Dp // block_d

    stacked = (2 * G <= 8)
    if stacked:
        scratch = [pltpu.VMEM((2 * G, 2 * G), jnp.float32)]   # stacked Gram acc
    else:
        scratch = [pltpu.VMEM((G, G), jnp.float32),           # teacher Gram acc
                   pltpu.VMEM((G, G), jnp.float32)]           # student Gram acc

    new_t, new_s, dist_part, cos_part = pl.pallas_call(
        _make_structure_kernel(stacked),
        out_shape=(
            jax.ShapeDtypeStruct((Lm1, G, Dp), t_state.dtype),
            jax.ShapeDtypeStruct((Lm1, G, Dp), s_state.dtype),
            jax.ShapeDtypeStruct((Lm1, 1, 128), jnp.float32),
            jax.ShapeDtypeStruct((Lm1, 1, 128), jnp.float32),
        ),
        grid_spec=pltpu.PrefetchScalarGridSpec(
            num_scalar_prefetch=0,
            grid=(Lm1, Kt),
            in_specs=[
                pl.BlockSpec((1, G, block_d), lambda l, k: (l, 0, k)),
                pl.BlockSpec((1, G, block_d), lambda l, k: (l, 0, k)),
                pl.BlockSpec((1, B, block_d), lambda l, k: (l, 0, k)),
                pl.BlockSpec((1, B, block_d), lambda l, k: (l, 0, k)),
            ],
            out_specs=[
                pl.BlockSpec((1, G, block_d), lambda l, k: (l, 0, k)),
                pl.BlockSpec((1, G, block_d), lambda l, k: (l, 0, k)),
                pl.BlockSpec((1, 1, 128), lambda l, k: (l, 0, 0)),
                pl.BlockSpec((1, 1, 128), lambda l, k: (l, 0, 0)),
            ],
            scratch_shapes=scratch,
        ),
        compiler_params=pltpu.CompilerParams(
            dimension_semantics=("parallel", "arbitrary"),
            vmem_limit_bytes=vmem_limit),
    )(t_state, s_state, t_hidden, s_hidden)

    if pad:
        new_t = new_t[:, :, :D]
        new_s = new_s[:, :, :D]

    n_elem = Lm1 * G * G   # mse_loss over the full (L-1, G, G) tensors = mean
    dist_loss = jnp.sum(dist_part[:, 0, 0]) / n_elem
    cos_loss = jnp.sum(cos_part[:, 0, 0]) / n_elem
    return dist_loss, cos_loss, new_t, new_s


def external_structure_forward(teacher, student, length,
                               teacher_initialize, student_initialize,
                               block_d=None):
    """teacher/student: tuples whose element [3] is (length, B, S, H).
    Returns (distance_loss, cosine_loss, new_teacher_state, new_student_state)
    — the state buffers of the nn.Module are handled functionally."""
    t_hidden = teacher[3][:length]
    s_hidden = student[3][:length]
    Lm1, B, S, H = t_hidden.shape
    t_flat = t_hidden.reshape(Lm1, B, S * H)
    s_flat = s_hidden.reshape(Lm1, B, S * H)
    return external_structure_pallas(teacher_initialize, student_initialize,
                                     t_flat, s_flat, block_d=block_d)


def _ref_forward(t_state, s_state, t_hidden, s_hidden):
    """Pure-JAX reference reproducing the PyTorch module exactly."""
    Lm1, B, S, H = t_hidden.shape
    D = S * H
    t_cent = jnp.mean(t_hidden, axis=1).reshape(Lm1, 1, D)
    s_cent = jnp.mean(s_hidden, axis=1).reshape(Lm1, 1, D)
    new_t = jnp.concatenate([t_state, t_cent], axis=1)[:, 1:, :]
    new_s = jnp.concatenate([s_state, s_cent], axis=1)[:, 1:, :]
    hi = lax.Precision.HIGHEST

    def pair(x):
        gram = jnp.einsum('lgd,lhd->lgh', x, x, precision=hi)
        sq = jnp.sum(x * x, -1, keepdims=True)
        sqd = jnp.maximum(sq + jnp.swapaxes(sq, -1, -2) - 2.0 * gram, 0.0)
        eucl = jnp.sqrt(sqd + 1e-8)
        xn = x / jnp.maximum(jnp.sqrt(sq), 1e-12)
        cos = jnp.einsum('lgd,lhd->lgh', xn, xn, precision=hi)
        return eucl, cos

    te, tc = pair(new_t)
    se, sc = pair(new_s)
    return (jnp.mean((te - se) ** 2), jnp.mean((tc - sc) ** 2), new_t, new_s)


if __name__ == "__main__":
    def run_case(Lm1, G, B, S, H, block_d, seed):
        D = S * H
        key = jax.random.PRNGKey(seed)
        k1, k2, k3, k4 = jax.random.split(key, 4)
        t_hidden = jax.random.normal(k1, (Lm1, B, S, H), dtype=jnp.float32)
        s_hidden = jax.random.normal(k2, (Lm1, B, S, H), dtype=jnp.float32)
        # non-trivial (post-warmup) state so the cosine path is exercised;
        # the module zero-initializes these buffers and fills them over steps.
        t_state = jax.random.normal(k3, (Lm1, G, D), dtype=jnp.float32)
        s_state = jax.random.normal(k4, (Lm1, G, D), dtype=jnp.float32)

        # teacher/student mimic the tuple-of-outputs indexing teacher[3][i]
        teacher = (None, None, None, t_hidden)
        student = (None, None, None, s_hidden)

        out = external_structure_forward(teacher, student, Lm1,
                                         t_state, s_state, block_d=block_d)
        jax.block_until_ready(out)
        dist_loss, cos_loss, new_t, new_s = out

        ref_dist, ref_cos, ref_t, ref_s = _ref_forward(
            t_state, s_state, t_hidden, s_hidden)

        assert np.allclose(np.asarray(new_t), np.asarray(ref_t),
                           rtol=1e-6, atol=1e-6)
        assert np.allclose(np.asarray(new_s), np.asarray(ref_s),
                           rtol=1e-6, atol=1e-6)
        assert np.allclose(np.asarray(dist_loss), np.asarray(ref_dist),
                           rtol=1e-3, atol=1e-5)
        assert np.allclose(np.asarray(cos_loss), np.asarray(ref_cos),
                           rtol=1e-3, atol=1e-5)

    # stacked-Gram path (2G <= 8): num_hidden_layers=4 -> L-1=3, G=4,
    # hidden=32, seq=8 -> D=256, batch=2; block_d=128 -> 2-step D reduction
    run_case(Lm1=3, G=4, B=2, S=8, H=32, block_d=128, seed=0)
    # split-Gram path (2G > 8): G=8 (the stacked form is only for MXU fill)
    run_case(Lm1=2, G=8, B=2, S=8, H=32, block_d=128, seed=1)

    print("KERNEL_OK")
</pallas_src>

<mosaic_0001>
module attributes {stable_mosaic.version = 11 : i64} {
  func.func @kernel(%arg0: i32, %arg1: i32, %arg2: memref<1x4x128xf32, #tpu.memory_space<vmem>>, %arg3: memref<1x4x128xf32, #tpu.memory_space<vmem>>, %arg4: memref<1x2x128xf32, #tpu.memory_space<vmem>>, %arg5: memref<1x2x128xf32, #tpu.memory_space<vmem>>, %arg6: memref<1x4x128xf32, #tpu.memory_space<vmem>>, %arg7: memref<1x4x128xf32, #tpu.memory_space<vmem>>, %arg8: memref<1x1x128xf32, #tpu.memory_space<vmem>>, %arg9: memref<1x1x128xf32, #tpu.memory_space<vmem>>, %arg10: memref<8x8xf32, #tpu.memory_space<vmem>>) attributes {dimension_semantics = [#tpu.dimension_semantics<parallel>, #tpu.dimension_semantics<arbitrary>], iteration_bounds = array<i64: 3, 2>, scalar_prefetch = 0 : i64, scratch_operands = 1 : i64, tpu.core_type = #tpu.core_type<tc>, window_params = [{transform_indices = @transform_0, window_bounds = array<i64: 1, 4, 128>}, {transform_indices = @transform_1, window_bounds = array<i64: 1, 4, 128>}, {transform_indices = @transform_2, window_bounds = array<i64: 1, 2, 128>}, {transform_indices = @transform_3, window_bounds = array<i64: 1, 2, 128>}, {transform_indices = @transform_4, window_bounds = array<i64: 1, 4, 128>}, {transform_indices = @transform_5, window_bounds = array<i64: 1, 4, 128>}, {transform_indices = @transform_6, window_bounds = array<i64: 1, 1, 128>}, {transform_indices = @transform_7, window_bounds = array<i64: 1, 1, 128>}]} {
    %c0_i32 = arith.constant 0 : i32
    %0 = arith.cmpi eq, %arg1, %c0_i32 : i32
    %1 = arith.extui %0 : i1 to i32
    %c0_i32_0 = arith.constant 0 : i32
    %2 = arith.cmpi ne, %1, %c0_i32_0 : i32
    scf.if %2 {
      %cst_26 = arith.constant 0.000000e+00 : f32
      %35 = vector.broadcast %cst_26 : f32 to vector<8x8xf32>
      %c0_27 = arith.constant 0 : index
      %c0_28 = arith.constant 0 : index
      %36 = vector.load %arg10[%c0_27, %c0_28] : memref<8x8xf32, #tpu.memory_space<vmem>>, vector<8x8xf32>
      tpu.vector_store %arg10[%c0_27, %c0_28], %35 {strides = array<i32>} : memref<8x8xf32, #tpu.memory_space<vmem>>, vector<8x8xf32>,
    } else {
    }
    %c0 = arith.constant 0 : index
    %c0_1 = arith.constant 0 : index
    %c0_2 = arith.constant 0 : index
    %3 = vector.load %arg4[%c0, %c0_1, %c0_2] : memref<1x2x128xf32, #tpu.memory_space<vmem>>, vector<1x2x128xf32>
    %4 = vector.shape_cast %3 : vector<1x2x128xf32> to vector<2x128xf32>
    %cst = arith.constant dense<0.000000e+00> : vector<128xf32>
    %5 = vector.multi_reduction <add>, %4, %cst [0] : vector<2x128xf32> to vector<128xf32>
    %6 = vector.shape_cast %5 : vector<128xf32> to vector<1x128xf32>
    %cst_3 = arith.constant 2.000000e+00 : f32
    %7 = vector.broadcast %cst_3 : f32 to vector<1x128xf32>
    %8 = arith.divf %6, %7 : vector<1x128xf32>
    %c0_4 = arith.constant 0 : index
    %c0_5 = arith.constant 0 : index
    %c0_6 = arith.constant 0 : index
    %9 = vector.load %arg5[%c0_4, %c0_5, %c0_6] : memref<1x2x128xf32, #tpu.memory_space<vmem>>, vector<1x2x128xf32>
    %10 = vector.shape_cast %9 : vector<1x2x128xf32> to vector<2x128xf32>
    %cst_7 = arith.constant dense<0.000000e+00> : vector<128xf32>
    %11 = vector.multi_reduction <add>, %10, %cst_7 [0] : vector<2x128xf32> to vector<128xf32>
    %12 = vector.shape_cast %11 : vector<128xf32> to vector<1x128xf32>
    %cst_8 = arith.constant 2.000000e+00 : f32
    %13 = vector.broadcast %cst_8 : f32 to vector<1x128xf32>
    %14 = arith.divf %12, %13 : vector<1x128xf32>
    %c0_9 = arith.constant 0 : index
    %c1 = arith.constant 1 : index
    %c0_10 = arith.constant 0 : index
    %15 = vector.load %arg2[%c0_9, %c1, %c0_10] : memref<1x4x128xf32, #tpu.memory_space<vmem>>, vector<1x3x128xf32>
    %16 = vector.shape_cast %15 : vector<1x3x128xf32> to vector<3x128xf32>
    %17 = tpu.concatenate %16, %8 in 0 : vector<3x128xf32>, vector<1x128xf32> -> vector<4x128xf32>
    %c0_11 = arith.constant 0 : index
    %c1_12 = arith.constant 1 : index
    %c0_13 = arith.constant 0 : index
    %18 = vector.load %arg3[%c0_11, %c1_12, %c0_13] : memref<1x4x128xf32, #tpu.memory_space<vmem>>, vector<1x3x128xf32>
    %19 = vector.shape_cast %18 : vector<1x3x128xf32> to vector<3x128xf32>
    %20 = tpu.concatenate %19, %14 in 0 : vector<3x128xf32>, vector<1x128xf32> -> vector<4x128xf32>
    %c0_14 = arith.constant 0 : index
    %c0_15 = arith.constant 0 : index
    %c0_16 = arith.constant 0 : index
    %21 = vector.load %arg6[%c0_14, %c0_15, %c0_16] : memref<1x4x128xf32, #tpu.memory_space<vmem>>, vector<1x4x128xf32>
    %22 = vector.shape_cast %21 : vector<1x4x128xf32> to vector<4x128xf32>
    %23 = vector.shape_cast %17 : vector<4x128xf32> to vector<1x4x128xf32>
    tpu.vector_store %arg6[%c0_14, %c0_15, %c0_16], %23 {strides = array<i32>} : memref<1x4x128xf32, #tpu.memory_space<vmem>>, vector<1x4x128xf32>,
    %c0_17 = arith.constant 0 : index
    %c0_18 = arith.constant 0 : index
    %c0_19 = arith.constant 0 : index
    %24 = vector.load %arg7[%c0_17, %c0_18, %c0_19] : memref<1x4x128xf32, #tpu.memory_space<vmem>>, vector<1x4x128xf32>
    %25 = vector.shape_cast %24 : vector<1x4x128xf32> to vector<4x128xf32>
    %26 = vector.shape_cast %20 : vector<4x128xf32> to vector<1x4x128xf32>
    tpu.vector_store %arg7[%c0_17, %c0_18, %c0_19], %26 {strides = array<i32>} : memref<1x4x128xf32, #tpu.memory_space<vmem>>, vector<1x4x128xf32>,
    %27 = tpu.concatenate %17, %20 in 0 : vector<4x128xf32>, vector<4x128xf32> -> vector<8x128xf32>
    %c0_20 = arith.constant 0 : index
    %c0_21 = arith.constant 0 : index
    %28 = vector.load %arg10[%c0_20, %c0_21] : memref<8x8xf32, #tpu.memory_space<vmem>>, vector<8x8xf32>
    %cst_22 = arith.constant dense<0.000000e+00> : vector<8x8xf32>
    %29 = tpu.matmul %27, %27, %cst_22 {dimension_numbers = #tpu.dot_dimension_numbers<[1], [1], [0], [0], [0, 0, 1, 0], [], []>, precision = #tpu.contract_precision<fp32>} : vector<8x128xf32>, vector<8x128xf32>, vector<8x8xf32> -> vector<8x8xf32>
    %30 = arith.addf %28, %29 : vector<8x8xf32>
    %c0_23 = arith.constant 0 : index
    %c0_24 = arith.constant 0 : index
    %31 = vector.load %arg10[%c0_23, %c0_24] : memref<8x8xf32, #tpu.memory_space<vmem>>, vector<8x8xf32>
    tpu.vector_store %arg10[%c0_23, %c0_24], %30 {strides = array<i32>} : memref<8x8xf32, #tpu.memory_space<vmem>>, vector<8x8xf32>,
    %c1_i32 = arith.constant 1 : i32
    %32 = arith.cmpi eq, %arg1, %c1_i32 : i32
    %33 = arith.extui %32 : i1 to i32
    %c0_i32_25 = arith.constant 0 : i32
    %34 = arith.cmpi ne, %33, %c0_i32_25 : i32
    scf.if %34 {
      %c0_26 = arith.constant 0 : index
      %c0_27 = arith.constant 0 : index
      %35 = vector.load %arg10[%c0_26, %c0_27] : memref<8x8xf32, #tpu.memory_space<vmem>>, vector<8x8xf32>
      %36 = vector.extract_strided_slice %35 {offsets = [0, 0], sizes = [4, 4], strides = [1, 1]} : vector<8x8xf32> to vector<4x4xf32>
      %37 = vector.extract_strided_slice %35 {offsets = [4, 4], sizes = [4, 4], strides = [1, 1]} : vector<8x8xf32> to vector<4x4xf32>
      %38 = tpu.iota {dimensions = array<i32: 0>} : vector<4x4xi32>
      %39 = tpu.iota {dimensions = array<i32: 1>} : vector<4x4xi32>
      %40 = arith.cmpi eq, %38, %39 : vector<4x4xi32>
      %cst_28 = arith.constant 0.000000e+00 : f32
      %41 = vector.broadcast %cst_28 : f32 to vector<4x4xf32>
      %42 = arith.select %40, %36, %41 : vector<4x4xi1>, vector<4x4xf32>
      %cst_29 = arith.constant dense<0.000000e+00> : vector<4xf32>
      %43 = vector.multi_reduction <add>, %42, %cst_29 [1] : vector<4x4xf32> to vector<4xf32>
      %44 = vector.shape_cast %43 : vector<4xf32> to vector<4x1xf32>
      %cst_30 = arith.constant dense<0.000000e+00> : vector<4xf32>
      %45 = vector.multi_reduction <add>, %42, %cst_30 [0] : vector<4x4xf32> to vector<4xf32>
      %46 = vector.shape_cast %45 : vector<4xf32> to vector<1x4xf32>
      %47 = vector.broadcast %44 : vector<4x1xf32> to vector<4x4xf32>
      %48 = vector.broadcast %46 : vector<1x4xf32> to vector<4x4xf32>
      %49 = arith.addf %47, %48 : vector<4x4xf32>
      %cst_31 = arith.constant 2.000000e+00 : f32
      %50 = vector.broadcast %cst_31 : f32 to vector<4x4xf32>
      %51 = arith.mulf %50, %36 : vector<4x4xf32>
      %52 = arith.subf %49, %51 : vector<4x4xf32>
      %cst_32 = arith.constant 0.000000e+00 : f32
      %53 = vector.broadcast %cst_32 : f32 to vector<4x4xf32>
      %54 = arith.maximumf %52, %53 : vector<4x4xf32>
      %cst_33 = arith.constant 9.99999993E-9 : f32
      %55 = vector.broadcast %cst_33 : f32 to vector<4x4xf32>
      %56 = arith.addf %54, %55 : vector<4x4xf32>
      %57 = math.sqrt %56 : vector<4x4xf32>
      %58 = math.sqrt %44 : vector<4x1xf32>
      %cst_34 = arith.constant 9.99999996E-13 : f32
      %59 = vector.broadcast %cst_34 : f32 to vector<4x1xf32>
      %60 = arith.maximumf %58, %59 : vector<4x1xf32>
      %cst_35 = arith.constant 1.000000e+00 : f32
      %61 = vector.broadcast %cst_35 : f32 to vector<4x1xf32>
      %62 = arith.divf %61, %60 : vector<4x1xf32>
      %63 = math.sqrt %46 : vector<1x4xf32>
      %cst_36 = arith.constant 9.99999996E-13 : f32
      %64 = vector.broadcast %cst_36 : f32 to vector<1x4xf32>
      %65 = arith.maximumf %63, %64 : vector<1x4xf32>
      %cst_37 = arith.constant 1.000000e+00 : f32
      %66 = vector.broadcast %cst_37 : f32 to vector<1x4xf32>
      %67 = arith.divf %66, %65 : vector<1x4xf32>
      %68 = vector.broadcast %62 : vector<4x1xf32> to vector<4x4xf32>
      %69 = arith.mulf %36, %68 : vector<4x4xf32>
      %70 = vector.broadcast %67 : vector<1x4xf32> to vector<4x4xf32>
      %71 = arith.mulf %69, %70 : vector<4x4xf32>
      %72 = tpu.iota {dimensions = array<i32: 0>} : vector<4x4xi32>
      %73 = tpu.iota {dimensions = array<i32: 1>} : vector<4x4xi32>
      %74 = arith.cmpi eq, %72, %73 : vector<4x4xi32>
      %cst_38 = arith.constant 0.000000e+00 : f32
      %75 = vector.broadcast %cst_38 : f32 to vector<4x4xf32>
      %76 = arith.select %74, %37, %75 : vector<4x4xi1>, vector<4x4xf32>
      %cst_39 = arith.constant dense<0.000000e+00> : vector<4xf32>
      %77 = vector.multi_reduction <add>, %76, %cst_39 [1] : vector<4x4xf32> to vector<4xf32>
      %78 = vector.shape_cast %77 : vector<4xf32> to vector<4x1xf32>
      %cst_40 = arith.constant dense<0.000000e+00> : vector<4xf32>
      %79 = vector.multi_reduction <add>, %76, %cst_40 [0] : vector<4x4xf32> to vector<4xf32>
      %80 = vector.shape_cast %79 : vector<4xf32> to vector<1x4xf32>
      %81 = vector.broadcast %78 : vector<4x1xf32> to vector<4x4xf32>
      %82 = vector.broadcast %80 : vector<1x4xf32> to vector<4x4xf32>
      %83 = arith.addf %81, %82 : vector<4x4xf32>
      %cst_41 = arith.constant 2.000000e+00 : f32
      %84 = vector.broadcast %cst_41 : f32 to vector<4x4xf32>
      %85 = arith.mulf %84, %37 : vector<4x4xf32>
      %86 = arith.subf %83, %85 : vector<4x4xf32>
      %cst_42 = arith.constant 0.000000e+00 : f32
      %87 = vector.broadcast %cst_42 : f32 to vector<4x4xf32>
      %88 = arith.maximumf %86, %87 : vector<4x4xf32>
      %cst_43 = arith.constant 9.99999993E-9 : f32
      %89 = vector.broadcast %cst_43 : f32 to vector<4x4xf32>
      %90 = arith.addf %88, %89 : vector<4x4xf32>
      %91 = math.sqrt %90 : vector<4x4xf32>
      %92 = math.sqrt %78 : vector<4x1xf32>
      %cst_44 = arith.constant 9.99999996E-13 : f32
      %93 = vector.broadcast %cst_44 : f32 to vector<4x1xf32>
      %94 = arith.maximumf %92, %93 : vector<4x1xf32>
      %cst_45 = arith.constant 1.000000e+00 : f32
      %95 = vector.broadcast %cst_45 : f32 to vector<4x1xf32>
      %96 = arith.divf %95, %94 : vector<4x1xf32>
      %97 = math.sqrt %80 : vector<1x4xf32>
      %cst_46 = arith.constant 9.99999996E-13 : f32
      %98 = vector.broadcast %cst_46 : f32 to vector<1x4xf32>
      %99 = arith.maximumf %97, %98 : vector<1x4xf32>
      %cst_47 = arith.constant 1.000000e+00 : f32
      %100 = vector.broadcast %cst_47 : f32 to vector<1x4xf32>
      %101 = arith.divf %100, %99 : vector<1x4xf32>
      %102 = vector.broadcast %96 : vector<4x1xf32> to vector<4x4xf32>
      %103 = arith.mulf %37, %102 : vector<4x4xf32>
      %104 = vector.broadcast %101 : vector<1x4xf32> to vector<4x4xf32>
      %105 = arith.mulf %103, %104 : vector<4x4xf32>
      %106 = arith.subf %57, %91 : vector<4x4xf32>
      %107 = arith.subf %71, %105 : vector<4x4xf32>
      %108 = arith.mulf %106, %106 : vector<4x4xf32>
      %109 = vector.shape_cast %108 : vector<4x4xf32> to vector<1x4x4xf32>
      %cst_48 = arith.constant dense<0.000000e+00> : vector<1xf32>
      %110 = vector.multi_reduction <add>, %109, %cst_48 [1, 2] : vector<1x4x4xf32> to vector<1xf32>
      %111 = vector.shape_cast %110 : vector<1xf32> to vector<1x1x1xf32>
      %112 = vector.extract %111[0, 0, 0] : f32 from vector<1x1x1xf32>
      %113 = vector.broadcast %112 : f32 to vector<1x1x128xf32>
      %c0_49 = arith.constant 0 : index
      %c0_50 = arith.constant 0 : index
      %c0_51 = arith.constant 0 : index
      %114 = vector.load %arg8[%c0_49, %c0_50, %c0_51] : memref<1x1x128xf32, #tpu.memory_space<vmem>>, vector<1x1x128xf32>
      tpu.vector_store %arg8[%c0_49, %c0_50, %c0_51], %113 {strides = array<i32>} : memref<1x1x128xf32, #tpu.memory_space<vmem>>, vector<1x1x128xf32>,
      %115 = arith.mulf %107, %107 : vector<4x4xf32>
      %116 = vector.shape_cast %115 : vector<4x4xf32> to vector<1x4x4xf32>
      %cst_52 = arith.constant dense<0.000000e+00> : vector<1xf32>
      %117 = vector.multi_reduction <add>, %116, %cst_52 [1, 2] : vector<1x4x4xf32> to vector<1xf32>
      %118 = vector.shape_cast %117 : vector<1xf32> to vector<1x1x1xf32>
      %119 = vector.extract %118[0, 0, 0] : f32 from vector<1x1x1xf32>
      %120 = vector.broadcast %119 : f32 to vector<1x1x128xf32>
      %c0_53 = arith.constant 0 : index
      %c0_54 = arith.constant 0 : index
      %c0_55 = arith.constant 0 : index
      %121 = vector.load %arg9[%c0_53, %c0_54, %c0_55] : memref<1x1x128xf32, #tpu.memory_space<vmem>>, vector<1x1x128xf32>
      tpu.vector_store %arg9[%c0_53, %c0_54, %c0_55], %120 {strides = array<i32>} : memref<1x1x128xf32, #tpu.memory_space<vmem>>, vector<1x1x128xf32>,
    } else {
    }
    return
  }
  func.func @transform_0(%arg0: i32, %arg1: i32) -> (i32, i32, i32) {
    %c0_i32 = arith.constant 0 : i32
    %c0_i32_0 = arith.constant 0 : i32
    return %arg0, %c0_i32, %arg1 : i32, i32, i32
  }
  func.func @transform_1(%arg0: i32, %arg1: i32) -> (i32, i32, i32) {
    %c0_i32 = arith.constant 0 : i32
    %c0_i32_0 = arith.constant 0 : i32
    return %arg0, %c0_i32, %arg1 : i32, i32, i32
  }
  func.func @transform_2(%arg0: i32, %arg1: i32) -> (i32, i32, i32) {
    %c0_i32 = arith.constant 0 : i32
    %c0_i32_0 = arith.constant 0 : i32
    return %arg0, %c0_i32, %arg1 : i32, i32, i32
  }
  func.func @transform_3(%arg0: i32, %arg1: i32) -> (i32, i32, i32) {
    %c0_i32 = arith.constant 0 : i32
    %c0_i32_0 = arith.constant 0 : i32
    return %arg0, %c0_i32, %arg1 : i32, i32, i32
  }
  func.func @transform_4(%arg0: i32, %arg1: i32) -> (i32, i32, i32) {
    %c0_i32 = arith.constant 0 : i32
    %c0_i32_0 = arith.constant 0 : i32
    return %arg0, %c0_i32, %arg1 : i32, i32, i32
  }
  func.func @transform_5(%arg0: i32, %arg1: i32) -> (i32, i32, i32) {
    %c0_i32 = arith.constant 0 : i32
    %c0_i32_0 = arith.constant 0 : i32
    return %arg0, %c0_i32, %arg1 : i32, i32, i32
  }
  func.func @transform_6(%arg0: i32, %arg1: i32) -> (i32, i32, i32) {
    %c0_i32 = arith.constant 0 : i32
    %c0_i32_0 = arith.constant 0 : i32
    %c0_i32_1 = arith.constant 0 : i32
    return %arg0, %c0_i32, %c0_i32_0 : i32, i32, i32
  }
  func.func @transform_7(%arg0: i32, %arg1: i32) -> (i32, i32, i32) {
    %c0_i32 = arith.constant 0 : i32
    %c0_i32_0 = arith.constant 0 : i32
    %c0_i32_1 = arith.constant 0 : i32
    return %arg0, %c0_i32, %c0_i32_0 : i32, i32, i32
  }
}

</mosaic_0001>

<bundles_post_ra>
// kernel: tpu_custom_call.1
= control target key start
LH: loop header
LB: loop body
LE: loop exit
PB: predicated region body
PF: predicated region fallthrough
CT: control target
= control target key end

     0   :  { %s2559_s0 = inlined_call_operand.hbm [shape: f32[3,4,256], index: 0, kind: input, shape index: {}]   ;;  %s2560_s1 = inlined_call_operand.hbm [shape: f32[3,4,256], index: 1, kind: input, shape index: {}]   ;;  %s2561_s2 = inlined_call_operand.hbm [shape: f32[3,2,256], index: 2, kind: input, shape index: {}]   ;;  %s2562_s3 = inlined_call_operand.hbm [shape: f32[3,2,256], index: 3, kind: input, shape index: {}]   ;;  %s2563_s4 = inlined_call_operand.hbm [shape: f32[3,4,256], index: 4, kind: output, shape index: {0}]   ;;  %s2564_s5 = inlined_call_operand.hbm [shape: f32[3,4,256], index: 5, kind: output, shape index: {1}]   ;;  %s2565_s6 = inlined_call_operand.hbm [shape: f32[3,1,128], index: 6, kind: output, shape index: {2}]   ;;  %s2566_s7 = inlined_call_operand.hbm [shape: f32[3,1,128], index: 7, kind: output, shape index: {3}]  }
   0x1   :  { %2589 = sst [smem:[#allocation37_spill]] %s2560_s1 }
   0x2   :  { %2590 = sst [smem:[#allocation38_spill]] %s2565_s6 }
   0x3   :  { %2591 = sst [smem:[#allocation39_spill]] %s2566_s7 }
   0x4   :  { %13 = vsyncpa [#allocation4], 0 }
   0x5   :  { %15 = vsyncpa [#allocation4 + $0x1], 0 }
   0x6   :  { %16 = vsyncpa [#allocation7], 0 }
   0x7   :  { %18 = vsyncpa [#allocation7 + $0x1], 0 }
   0x8   :  { %19 = vsyncpa [#allocation10], 0 }
   0x9   :  { %21 = vsyncpa [#allocation10 + $0x1], 0 }
   0xa   :  { %22 = vsyncpa [#allocation5], 0 }
   0xb   :  { %24 = vsyncpa [#allocation5 + $0x1], 0 }
   0xc   :  { %25 = vsyncpa [#allocation13], 0 }
   0xd   :  { %27 = vsyncpa [#allocation13 + $0x1], 0 }
   0xe   :  { %28 = vsyncpa [#allocation16], 0 }
   0xf   :  { %30 = vsyncpa [#allocation16 + $0x1], 0  ;;  %s2049_s24 = smov 0   ;;  %s2051_s25 = smov 0  }
  0x10   :  { %s2053_s26 = smov 0   ;;  %s2055_s27 = smov 0  }
  0x11   :  { %s2057_s28 = smov 0   ;;  %s2059_s29 = smov 0  }
  0x12   :  { %s2061_s30 = smov 0   ;;  %s2063_s8 = smov 0  }
  0x13   :  { %s2065_s9 = smov 0   ;;  %s2067_s10 = smov 0  }
  0x14   :  { %s2069_s11 = smov 0  }
  0x15 LB: > { %2592 = sst [smem:[#allocation24_spill]] %s1954_s24  ;;  %s2105_s12 = sadd.s32 4294967295, %s1994_s11   ;;  %s1994_s11 = sphi %s2069_s11, %s36_s11   ;;  %s1990_s10 = sphi %s2067_s10, %s2643_s10   ;;  %s1986_s9 = sphi %s2065_s9, %s2642_s9   ;;  %s1982_s8 = sphi %s2063_s8, %s2641_s8   ;;  %s1978_s30 = sphi %s2061_s30, %s2640_s30   ;;  %s1974_s29 = sphi %s2059_s29, %s2639_s29   ;;  %s1970_s28 = sphi %s2057_s28, %s2647_s28   ;;  %s1966_s27 = sphi %s2055_s27, %s2646_s27   ;;  %s1962_s26 = sphi %s2053_s26, %s2637_s26   ;;  %s1958_s25 = sphi %s2051_s25, %s2645_s25   ;;  %s1954_s24 = sphi %s2049_s24, %s2644_s24  }
  0x16   : > { %2593 = sst [smem:[#allocation25_spill]] %s1962_s26  ;;  %s2571_s13 = sadd.s32 4294967294, %s1994_s11  }
  0x17   : > { %2594 = sst [smem:[#allocation26_spill]] %s1966_s27  ;;  %s45_s14 = sadd.s32 1, %s1986_s9 }
  0x18   : > { %2595 = sst [smem:[#allocation27_spill]] %s1974_s29  ;;  %s48_s15 = sadd.s32 1, %s1990_s10 }
  0x19   : > { %2596 = sst [smem:[#allocation28_spill]] %s1986_s9  ;;  %p46_p0 = scmp.ge.s32.totalorder %s45_s14, 2 }
  0x1a   : > { %2597 = sst [smem:[#allocation29_spill]] %s1990_s10  ;;  %s57_s16 = sadd.s32 1, %s1974_s29 }
  0x1b   : > { %2598 = sst [smem:[#allocation30_spill]] %s1994_s11  ;;  %p64_p1 = scmp.ne.s32.totalorder %s1974_s29, %s1970_s28 }
  0x1c   : > { %p65_p2 = scmp.eq.s32.totalorder %s1994_s11, 0  ;;  %s2649_s14 = smov (%p46_p0, %s45_s14), 0 }
  0x1d   : > { %2599 = sst [smem:[#allocation31_spill]] %s2649_s14  ;;  %s2651_s15 = smov (!%p46_p0, %s48_s15), %s1990_s10 }
  0x1e   : > { %s53_s17 = ssub.s32 %s1986_s9, %s2649_s14  ;;  %p2119_p3 = por %p65_p2, %p64_p1 }
  0x1f   : > { %p50_p4 = scmp.ge.s32.totalorder %s2651_s15, 3  ;;  %p70_p5 = scmp.ne.s32.totalorder %s1970_s28, %s1966_s27 }
  0x20   : > { %p71_p6 = scmp.eq.s32.totalorder %s2105_s12, 0  ;;  %p180_p7 = scmp.eq.s32.totalorder %s2105_s12, 5 }
  0x21   : > { %s2653_s15 = smov (%p50_p4, %s2651_s15), 0  ;;  %p186_p10 = scmp.eq.s32.totalorder %s2571_s13, 5 }
  0x22   : > { %2601 = sst [smem:[#allocation32_spill]] %s2653_s15  ;;  %p2129_p8 = por %p71_p6, %p70_p5 }
  0x23   : > { %p2135_p9 = por %p180_p7, %p64_p1  ;;  %s52_s21 = ssub.s32 %s1990_s10, %s2653_s15 }
  0x24   : > { %s2602_s19 = scalar_select %p2129_p8, 1, 0 }
  0x25   : > { %s2603_s20 = scalar_select %p2135_p9, 1, 0 }
  0x26   : > { %s54_s22 = sor.u32 %s53_s17, %s52_s21  ;;  %p221_p11 = scmp.eq.s32.totalorder %s52_s21, 0 }
  0x27   : > { %p55_p12 = scmp.eq.s32.totalorder %s54_s22, 0  ;;  %p2143_p13 = por %p186_p10, %p70_p5 }
  0x28   : > { %s223_s14 = sadd.s32 1, %s1962_s26  ;;  %p233_p0 = scmp.ne.s32.totalorder %s1962_s26, %s1958_s25 }
  0x29   : > { %s2604_s23 = scalar_select %p2143_p13, 1, 0 }
  0x2a   : > { %s2151_s27 = scalar_select %p55_p12, %s1974_s29, %s57_s16  }
  0x2b   : > { %2605 = sst [smem:[#allocation33_spill]] %s2604_s23  ;;  %p2158_p1 = por %p233_p0, %p180_p7 }
  0x2c   : > { %2606 = sst [smem:[#allocation34_spill]] %s2151_s27  ;;  %p239_p2 = scmp.ne.s32.totalorder %s1958_s25, %s1954_s24 }
  0x2d   : > { %s2154_s7 = scalar_select %p221_p11, %s1962_s26, %s223_s14  }
  0x2e   : > { %s2608_s15 = scalar_select %p2158_p1, 1, 0 }
  0x2f   : > { %2607 = sst [smem:[#allocation35_spill]] %s2154_s7  ;;  %p1533_p4 = scmp.lt.s32.totalorder %s1994_s11, 6 }
  0x30   : > { %p2165_p6 = por %p239_p2, %p186_p10  ;;  %s2170_s21 = sand.u32 1, %s1974_s29  }
  0x31   : > { %s2578_s16 = sshll.u32 %s2170_s21, 2  ;;  %s1415_s22 = sshll.u32 %s1990_s10, 1 }
  0x32   : > { %s2609_s17 = scalar_select %p2165_p6, 1, 0 }
  0x33   : > { %s2175_s14 = sadd.s32 %s1986_s9, %s1415_s22  ;;  %p2179_p5 = pnand %p1533_p4, %p2119_p3 }
  0x34   : > { %2610 = sst [smem:[#allocation36_spill]] %s2609_s17  ;;  %s2579_s27 = sshll.u32 %s2175_s14, 6 }
  0x35   : > { %s2611_s13 = scalar_select %p2179_p5, 1, 0 }
  0x36   : > { %s306_s7 = sand.u32 1, %s1994_s11   ;;  %s2612_s1 = sld [smem:[#allocation37_spill]] }
  0x37   : > { %s310_s18 = scalar_lea.vmem [#allocation6], %s2578_s16  ;;  %s2198_s9 = scalar_lea.sflag [#allocation7], %s306_s7 }
  0x38   : > { %s319_s22 = sshll.u32 %s310_s18, 4  ;;  %p2204_p10 = pneg %p2179_p5  ;;  %s2195_s22 = int_to_ptr.vmem [resolvable:$true] %s319_s22 }
  0x3c   : > { %s2190_s24 = scalar_lea.hbm %s2612_s1, %s2579_s27  ;;  %s1653_s18 = scalar_lea.hbm %s2612_s1, 384 }
  0x3d   : > { %s1648_s17 = scalar_lea.hbm %s2190_s24, 64  ;;  %p1654_p0 = scmp.lt.u32.totalorder %s2190_s24, %s2612_s1 }
  0x3e   : > { %p1649_p7 = scmp.ne.s32.totalorder %s2190_s24, %s1648_s17  ;;  %p1655_p2 = scmp.lt.u32.totalorder %s1653_s18, %s1648_s17 }
  0x3f   : > { %p1657_p3 = scmp.lt.u32.totalorder %s1648_s17, %s2190_s24 }
  0x40   : > { %p1651_p11 = pnand %p2204_p10, %p1649_p7  ;;  %p1656_p4 = por %p1655_p2, %p1654_p0 }
  0x42   : > { %p1652_p12 = pneg %p1651_p11  ;;  %p1658_p6 = por %p1657_p3, %p1656_p4 }
  0x44   : > { %p1659_p13 = pnand %p1658_p6, %p1652_p12 }
  0x46   : > { %1662 = shalt.err (!%p1659_p13)
}
  0x47   : > { %s1663_s7 = scalar_lea.vmem %s2195_s22, 64  ;;  %s1996_s16 = smov [#allocation6]  }
  0x48   : > { %p1664_p7 = scmp.ne.s32.totalorder %s2195_s22, %s1663_s7  ;;  %s1668_s29 = sshll.u32 %s1996_s16, 4  ;;  %s1669_s29 = int_to_ptr.vmem [resolvable:$false] %s1668_s29 }
  0x49   : > { %s1670_s27 = scalar_lea.vmem %s1669_s29, 128  ;;  %p1671_p9 = scmp.lt.s32.totalorder %s2195_s22, %s1669_s29 }
  0x4a   : > { %p1666_p11 = pnand %p1664_p7, %p2204_p10  ;;  %p1672_p8 = scmp.lt.s32.totalorder %s1670_s27, %s1663_s7 }
  0x4c   : > { %p1667_p1 = pneg %p1666_p11  ;;  %p1673_p0 = por %p1672_p8, %p1671_p9 }
  0x4e   : > { %p1674_p2 = pnand %p1673_p0, %p1667_p1 }
  0x50   : > { %1677 = shalt.err (!%p1674_p2)
}
  0x51   : > { %1513 = dma.hbm_to_vmem [thread:$0]  (!%p2179_p5), %s2190_s24, 64, %s2195_s22, %s2198_s9  }
  0x52   : > { %p364_p13 = scmp.lt.s32.totalorder %s1994_s11, 7  ;;  %p2614_p6 = scmp.ge.s32.totalorder %s1994_s11, 1 }
  0x53   : > { %s2616_s17 = sshll.u32 %s2175_s14, 6  ;;  %s2617_s29 = sshll.u32 %s2170_s21, 2 }
  0x54   : > { %p2231_p3 = pnand %p2614_p6, %p364_p13  ;;  %s2240_s16 = scalar_lea.hbm %s2559_s0, %s2616_s17 }
  0x55   : > { %s290_s27 = scalar_lea.vmem [#allocation3], %s2617_s29  ;;  %s1420_s24 = sshll.u32 %s2170_s21, 1 }
  0x56   : > { %s2615_s10 = scalar_select %p2231_p3, 1, 0 }
  0x57   : > { %s299_s1 = sshll.u32 %s290_s27, 4  ;;  %s287_s22 = scalar_lea.sflag [#allocation4], %s2170_s21  ;;  %s2244_s1 = int_to_ptr.vmem [resolvable:$true] %s299_s1 }
  0x58   : > { %s1678_s23 = scalar_lea.hbm %s2240_s16, 64  ;;  %s1683_s17 = scalar_lea.hbm %s2559_s0, 384 }
  0x59   : > { %p1679_p8 = scmp.ne.s32.totalorder %s2240_s16, %s1678_s23  ;;  %p1684_p12 = scmp.lt.u32.totalorder %s2240_s16, %s2559_s0 }
  0x5a   : > { %p1685_p4 = scmp.lt.u32.totalorder %s1683_s17, %s1678_s23  ;;  %p1687_p11 = scmp.lt.u32.totalorder %s1678_s23, %s2240_s16 }
  0x5b   : > { %p1681_p9 = pnand %p1679_p8, %p2204_p10 }
  0x5c   : > { %p1686_p7 = por %p1685_p4, %p1684_p12 }
  0x5d   : > { %p1682_p1 = pneg %p1681_p9 }
  0x5e   : > { %p1688_p0 = por %p1687_p11, %p1686_p7 }
  0x60   : > { %p1689_p2 = pnand %p1688_p0, %p1682_p1 }
  0x62   : > { %1692 = shalt.err (!%p1689_p2)
}
  0x63   : > { %s1693_s29 = scalar_lea.vmem %s2244_s1, 64  ;;  %s1997_s11 = smov [#allocation3]  }
  0x64   : > { %p1694_p13 = scmp.ne.s32.totalorder %s2244_s1, %s1693_s29  ;;  %s1698_s27 = sshll.u32 %s1997_s11, 4  ;;  %s1699_s27 = int_to_ptr.vmem [resolvable:$false] %s1698_s27 }
  0x65   : > { %s1700_s6 = scalar_lea.vmem %s1699_s27, 128  ;;  %p1701_p9 = scmp.lt.s32.totalorder %s2244_s1, %s1699_s27 }
  0x66   : > { %p1696_p6 = pnand %p1694_p13, %p2204_p10  ;;  %p1702_p3 = scmp.lt.s32.totalorder %s1700_s6, %s1693_s29 }
  0x68   : > { %p1697_p8 = pneg %p1696_p6  ;;  %p1703_p12 = por %p1702_p3, %p1701_p9 }
  0x6a   : > { %p1704_p4 = pnand %p1703_p12, %p1697_p8 }
  0x6c   : > { %1707 = shalt.err (!%p1704_p4)
}
  0x6d   : > { %1510 = dma.hbm_to_vmem [thread:$0]  (!%p2179_p5), %s2240_s16, 64, %s2244_s1, %s287_s22  }
  0x6e   : > { %s2618_s23 = sshll.u32 %s2175_s14, 5  ;;  %s330_s29 = scalar_lea.vmem [#allocation8], %s1420_s24 }
  0x6f   : > { %s2274_s7 = scalar_lea.hbm %s2561_s2, %s2618_s23  ;;  %s339_s11 = sshll.u32 %s330_s29, 4  ;;  %s340_s11 = int_to_ptr.vmem [resolvable:$true] %s339_s11 }
  0x70   : > { %s1708_s27 = scalar_lea.hbm %s2274_s7, 32  ;;  %s1713_s22 = scalar_lea.hbm %s2561_s2, 192 }
  0x71   : > { %p1709_p3 = scmp.ne.s32.totalorder %s2274_s7, %s1708_s27  ;;  %p1714_p11 = scmp.lt.u32.totalorder %s2274_s7, %s2561_s2 }
  0x72   : > { %p1715_p0 = scmp.lt.u32.totalorder %s1713_s22, %s1708_s27  ;;  %p1717_p13 = scmp.lt.u32.totalorder %s1708_s27, %s2274_s7 }
  0x73   : > { %p1711_p1 = pnand %p1709_p3, %p2204_p10 }
  0x74   : > { %p1716_p2 = por %p1715_p0, %p1714_p11 }
  0x75   : > { %p1712_p7 = pneg %p1711_p1 }
  0x76   : > { %p1718_p6 = por %p1717_p13, %p1716_p2 }
  0x78   : > { %p1719_p8 = pnand %p1718_p6, %p1712_p7 }
  0x7a   : > { %1722 = shalt.err (!%p1719_p8)
}
  0x7b   : > { %s1723_s18 = scalar_lea.vmem %s340_s11, 32  ;;  %s1998_s17 = smov [#allocation8]  }
  0x7c   : > { %p1724_p9 = scmp.ne.s32.totalorder %s340_s11, %s1723_s18  ;;  %s1728_s29 = sshll.u32 %s1998_s17, 4  ;;  %s1729_s29 = int_to_ptr.vmem [resolvable:$false] %s1728_s29 }
  0x7d   : > { %s1730_s1 = scalar_lea.vmem %s1729_s29, 64  ;;  %p1731_p3 = scmp.lt.s32.totalorder %s340_s11, %s1729_s29 }
  0x7e   : > { %p1726_p12 = pnand %p1724_p9, %p2204_p10  ;;  %p1732_p1 = scmp.lt.s32.totalorder %s1730_s1, %s1723_s18 }
  0x80   : > { %p1727_p4 = pneg %p1726_p12  ;;  %p1733_p5 = por %p1732_p1, %p1731_p3 }
  0x82   : > { %p1734_p0 = pnand %p1733_p5, %p1727_p4 }
  0x84   : > { %1737 = shalt.err (!%p1734_p0)
}
  0x85   : > { %p2619_p11 = scmp.ne.s32.totalorder %s2611_s13, 0  ;;  %s2620_s27 = sshll.u32 %s2175_s14, 5 }
  0x86   : > { %s2301_s6 = scalar_lea.hbm %s2562_s3, %s2620_s27  ;;  %s350_s23 = scalar_lea.vmem [#allocation9], %s1420_s24 }
  0x87   : > { %1516 = dma.hbm_to_vmem [thread:$0]  (!%p2619_p11), %s2274_s7, 32, %s340_s11, %s2198_s9  }
  0x88   : > { %s359_s18 = sshll.u32 %s350_s23, 4  ;;  %s347_s17 = scalar_lea.sflag [#allocation10], %s2170_s21  ;;  %s360_s18 = int_to_ptr.vmem [resolvable:$true] %s359_s18 }
  0x89   : > { %s1738_s29 = scalar_lea.hbm %s2301_s6, 32  ;;  %s1743_s7 = scalar_lea.hbm %s2562_s3, 192 }
  0x8a   : > { %p1739_p5 = scmp.ne.s32.totalorder %s2301_s6, %s1738_s29  ;;  %p1744_p13 = scmp.lt.u32.totalorder %s2301_s6, %s2562_s3 }
  0x8b   : > { %p1745_p6 = scmp.lt.u32.totalorder %s1743_s7, %s1738_s29  ;;  %p1747_p9 = scmp.lt.u32.totalorder %s1738_s29, %s2301_s6 }
  0x8c   : > { %p1741_p7 = pnand %p1739_p5, %p2204_p10 }
  0x8d   : > { %p1746_p8 = por %p1745_p6, %p1744_p13 }
  0x8e   : > { %p1742_p2 = pneg %p1741_p7 }
  0x8f   : > { %p1748_p12 = por %p1747_p9, %p1746_p8 }
  0x91   : > { %p1749_p4 = pnand %p1748_p12, %p1742_p2 }
  0x93   : > { %1752 = shalt.err (!%p1749_p4)
}
  0x94   : > { %s1753_s21 = scalar_lea.vmem %s360_s18, 32  ;;  %s1999_s24 = smov [#allocation9]  }
  0x95   : > { %p1754_p3 = scmp.ne.s32.totalorder %s360_s18, %s1753_s21  ;;  %s1758_s27 = sshll.u32 %s1999_s24, 4  ;;  %s1759_s27 = int_to_ptr.vmem [resolvable:$false] %s1758_s27 }
  0x96   : > { %s1760_s16 = scalar_lea.vmem %s1759_s27, 64  ;;  %p1761_p5 = scmp.lt.s32.totalorder %s360_s18, %s1759_s27 }
  0x97   : > { %p1756_p1 = pnand %p1754_p3, %p2204_p10  ;;  %p1762_p7 = scmp.lt.s32.totalorder %s1760_s16, %s1753_s21 }
  0x99   : > { %p1757_p0 = pneg %p1756_p1  ;;  %p1763_p11 = por %p1762_p7, %p1761_p5 }
  0x9b   : > { %p1764_p6 = pnand %p1763_p11, %p1757_p0 }
  0x9d   : > { %1767 = shalt.err (!%p1764_p6)
}
  0x9e   : > { %p2621_p13 = scmp.ne.s32.totalorder %s2611_s13, 0  ;;  %p2622_p2 = scmp.ne.s32.totalorder %s2615_s10, 0 }
  0x9f   : > { %s2326_s26 = sand.u32 (!%p2622_p2), 1, %s1970_s28   ;;  %p2623_p10 = scmp.ne.s32.totalorder (!%p2622_p2), %s2602_s19, 0 }
  0xa0   : > { %1519 = dma.hbm_to_vmem [thread:$0]  (!%p2621_p13), %s2301_s6, 32, %s360_s18, %s347_s17  }
  0xa1   : > { %368 = sbr.rel (%p2622_p2) target bundleno = 1172 (0x494), region = 36  ;;  %s2329_s22 = sshll.u32 (!%p2622_p2), %s2326_s26, 2 }
  0xa2   : > { %s371_s23 = scalar_lea.sflag (!%p2622_p2), [#allocation4], %s2326_s26  ;;  %s374_s29 = scalar_lea.vmem (!%p2622_p2), [#allocation3], %s2329_s22 }
  0xa8   : > { %1925 = dma.done.wait (%p2623_p10), %s371_s23, 64  }
  0xa9   : > { %1927 = vsyncadd (%p2623_p10), %s371_s23, 4294967232  ;;  %s379_s13 = sand.u32 1, %s2105_s12   ;;  %s383_s6 = scalar_lea.vmem [#allocation6], %s2329_s22 }
  0xaa   : > { %s380_s10 = scalar_lea.sflag [#allocation7], %s379_s13 }
  0xab   : > { %1929 = dma.done.wait (%p2623_p10), %s380_s10, 96  }
  0xac   : > { %1931 = vsyncadd (%p2623_p10), %s380_s10, 4294967200  ;;  %s1429_s18 = sshll.u32 %s2326_s26, 1  ;;  %s398_s9 = scalar_lea.sflag [#allocation10], %s2326_s26 }
  0xad   : > { %s392_s17 = scalar_lea.vmem [#allocation8], %s1429_s18  ;;  %s401_s14 = scalar_lea.vmem [#allocation9], %s1429_s18 }
  0xae   : > { %1933 = dma.done.wait (%p2623_p10), %s398_s9, 32  }
  0xaf   : > { %1935 = vsyncadd (%p2623_p10), %s398_s9, 4294967264  ;;  %s2352_s7 = sand.u32 1, %s1958_s25   ;;  %s440_s11 = scalar_lea.vmem [#allocation11], %s2329_s22 }
  0xb0   : > { %s447_s1 = scalar_lea.vmem [#allocation12], %s2329_s22  ;;  %s453_s21 = scalar_lea.vmem [#allocation14], %s2352_s7 }
  0xb1   : > { %s459_s24 = scalar_lea.vmem [#allocation15], %s2352_s7  ;;  %p1433_p11 = scmp.ne.s32.totalorder %s1978_s30, 0 }
  0xb2   : > { %vm464_vm0 = vcmask (!%p1433_p11), 64512   ;;  %v2000_v0 = vmov (!%p1433_p11), 0.0  }
  0xb3   : > { %463 = sbr.rel (%p1433_p11) target bundleno = 186 (0xba), region = 56  ;;  %465 = vst.msk [vmem:[#allocation2] sm:$0xff] (!%p1433_p11), %vm464_vm0, %v2000_v0 }
  0xba PF: > { %v466_v1 = vld [vmem:[%s392_s17] sm:$0x3]  ;;  %vm467_vm1 = vcmask 1041408   ;;  %v477_v2 = vld [vmem:[%s401_s14] sm:$0x3]  ;;  %v2001_v3 = vmov 0.0  }
  0xbb   : > { %1457 = vmatprep.subr.mxu0 %v2001_v3  ;;  %v468_v4 = vsel %vm467_vm1, %v466_v1, 0.0  ;;  %v478_v5 = vsel %vm467_vm1, %v477_v2, 0.0  ;;  %1462 = vmatprep.subr.mxu1 %v2001_v3  ;;  %vm2002_vm2 = vmmov 0   ;;  %v486_v18 = vld [vmem:[%s374_s29 + $0x1] sm:$0x7]  ;;  %vm487_vm3 = vcmask 1042432  }
  0xbc   : > { %v469_v6 = vrot.slane %v468_v4, 4  ;;  %v479_v7 = vrot.slane %v478_v5, 4  ;;  %1459 = vmatprep.mubr.msk.f32.mxu0 %vm2002_vm2, %v2001_v3  ;;  %1464 = vmatprep.mubr.msk.f32.mxu1 %vm2002_vm2, %v2001_v3  ;;  %v489_v19 = vld [vmem:[%s383_s6 + $0x1] sm:$0x7]  ;;  %vm496_vm4 = vcmask 1043456   ;;  %v498_v45 = vld [vmem:[#allocation2] sm:$0xff] }
  0xbd   : > { %vm946_vm5 = vcmask 64512   ;;  %p1434_p8 = scmp.ne.s32.totalorder %s1978_s30, 1 }
  0xbe   : > { %v470_v8 = vadd.f32 %v469_v6, %v468_v4  ;;  %v480_v9 = vadd.f32 %v479_v7, %v478_v5  ;;  %s2003_s19 = smov (!%p1434_p8), 124   ;;  %v953_v52 = vlaneseq (!%p1434_p8)  ;;  %vm959_vm7 = vcmask (!%p1434_p8), 27648   ;;  %s2004_s27 = smov (!%p1434_p8), 4  }
  0xc0   : > { %v471_v10 = vrot.slane %v470_v8, 2  ;;  %v481_v11 = vrot.slane %v480_v9, 2  ;;  %v954_v53 = vshrl.u32 (!%p1434_p8), %v953_v52, 7  ;;  %v956_v54 = vand.u32 (!%p1434_p8), 127, %v953_v52 }
  0xc2   : > { %v472_v12 = vadd.f32 %v471_v10, %v470_v8  ;;  %v482_v13 = vadd.f32 %v481_v11, %v480_v9  ;;  %vm957_vm6 = vcmp.eq.s32.totalorder (!%p1434_p8), %v954_v53, %v956_v54 }
  0xc4   : > { %v473_v14 = vrot.slane %v472_v12, 1  ;;  %v483_v15 = vrot.slane %v482_v13, 1 }
  0xc6   : > { %v474_v16 = vadd.f32 %v473_v14, %v472_v12  ;;  %v484_v17 = vadd.f32 %v483_v15, %v482_v13 }
  0xc8   : > { %v476_v20 = vmul.f32 0.5, %v474_v16  ;;  %v485_v21 = vmul.f32 0.5, %v484_v17 }
  0xca   : > { %v488_v22 = vsel %vm487_vm3, %v486_v18, %v476_v20  ;;  %v490_v23 = vsel %vm487_vm3, %v489_v19, %v485_v21 }
  0xcb   : > { %491 = vst [vmem:[%s440_s11] sm:$0xf] %v488_v22  ;;  %492 = vst [vmem:[%s447_s1] sm:$0xf] %v490_v23  ;;  %v494_v24 = vrot.slane %v490_v23, 4 }
  0xcd   : > { %v497_v25 = vsel %vm496_vm4, %v488_v22, %v494_v24 }
  0xce   : > { %v500_v26 = vand.u32 4294901760, %v497_v25 }
  0xd0   : > { %1458 = vmatpush3.xpose.msra.mxu0 %v500_v26  ;;  %v566_v27 = vsub.f32 %v497_v25, %v500_v26 }
  0xd1   : > { %1467 = vmatprep.subr.mxu0 %v2001_v3 }
  0xd2   : > { %v567_v28 = vand.u32 4294901760, %v566_v27 }
  0xd4   : > { %v568_v29 = vsub.f32 %v566_v27, %v567_v28 }
  0xd6   : > { %v569_v30 = vand.u32 4294901760, %v568_v29 }
  0xd8   : > { %1463 = vmatpush3.xpose.msra.mxu1 %v569_v30  ;;  %1460 = vmatmul.mubr.f32.vlgmr.msra.gmra.mrb[0].mxu0 %v569_v30 }
  0xd9   : > { %1468 = vmatpush3.xpose.msra.mxu0 %v566_v27  ;;  %1472 = vmatprep.subr.mxu1 %v2001_v3 }
  0xda   : > { %1469 = vmatprep.mubr.msk.f32.mxu0 %vm2002_vm2, %v2001_v3  ;;  %1477 = vmatprep.subr.mxu0 %v2001_v3 }
  0xdb   : > { %1465 = vmatmul.mubr.f32.vlgmr.msra.gmra.mrb[0].mxu1 %v500_v26 }
  0xdc   : > { %1473 = vmatpush3.xpose.msra.mxu1 %v500_v26  ;;  %1470 = vmatmul.mubr.f32.vlgmr.msra.gmra.mrb[2].mxu0 %v566_v27 }
  0xdd   : > { %1474 = vmatprep.mubr.msk.f32.mxu1 %vm2002_vm2, %v2001_v3  ;;  %1478 = vmatpush3.xpose.msra.mxu0 %v567_v28 }
  0xde   : > { %1482 = vmatprep.subr.mxu1 %v2001_v3  ;;  %1479 = vmatprep.mubr.msk.f32.mxu0 %vm2002_vm2, %v2001_v3 }
  0xdf   : > { %1475 = vmatmul.mubr.f32.vlgmr.msra.gmra.mrb[2].mxu1 %v567_v28 }
  0xe0   : > { %1483 = vmatpush3.xpose.msra.mxu1 %v500_v26  ;;  %1480 = vmatmul.mubr.f32.vlgmr.msra.gmra.mrb[4].mxu0 %v500_v26 }
  0xe1   : > { %1484 = vmatprep.mubr.msk.f32.mxu1 %vm2002_vm2, %v2001_v3 }
  0xe3   : > { %1485 = vmatmul.mubr.f32.vlgmr.msra.gmra.mrb[4].mxu1 %v500_v26 }
 0x1ab   : > { %v571_v31 = vpop.f32.mrb[0].mxu0 }
 0x1ac   : > { %v1461_v32 = vpop.f32.mrb[1].mxu0 }
 0x1ae   : > { %v647_v33 = vpop.f32.mrb[0].mxu1 }
 0x1af   : > { %v648_v34 = vadd.f32 %v647_v33, %v571_v31  ;;  %v1466_v35 = vpop.f32.mrb[1].mxu1  ;;  %v721_v36 = vpop.f32.mrb[2].mxu0 }
 0x1b0   : > { %v1471_v37 = vpop.f32.mrb[3].mxu0 }
 0x1b1   : > { %v722_v38 = vadd.f32 %v721_v36, %v648_v34 }
 0x1b2   : > { %v795_v39 = vpop.f32.mrb[2].mxu1 }
 0x1b3   : > { %v796_v40 = vadd.f32 %v795_v39, %v722_v38  ;;  %v1476_v41 = vpop.f32.mrb[3].mxu1  ;;  %v869_v42 = vpop.f32.mrb[4].mxu0 }
 0x1b4   : > { %v1481_v43 = vpop.f32.mrb[5].mxu0 }
 0x1b5   : > { %v870_v44 = vadd.f32 %v869_v42, %v796_v40  ;;  %951 = sbr.rel (%p1434_p8) target bundleno = 1074 (0x432), region = 60 }
 0x1b6   : > { %v941_v46 = vpop.f32.mrb[4].mxu1 }
 0x1b7   : > { %v942_v47 = vadd.f32 %v941_v46, %v870_v44  ;;  %v1486_v48 = vpop.f32.mrb[5].mxu1 }
 0x1b9   : > { %v945_v49 = vadd.f32 %v942_v47, %v498_v45 }
 0x1bb   : > { %947 = vst.msk [vmem:[#allocation2] sm:$0xff] %vm946_vm5, %v945_v49 }
 0x1c2   : > { %v2374_v50 = vld [vmem:[#allocation2] sm:$0xff] }
 0x1c3   : > { %v1004_v51 = vrot.slane %v2374_v50, 4  ;;  %v970_v0 = vmul.f32 2.0, %v2374_v50  ;;  %v958_v9 = vsel %vm957_vm6, %v2374_v50, 0.0 }
 0x1c4   : > { %v960_v10 = vsel %vm959_vm7, %v958_v9, 0.0 }
 0x1c5   : > { %1005 = vrot.lane.b32.xlu0 %v1004_v51, %s2003_s19  ;;  %v1020_v1 = vrot.slane %v970_v0, 4  ;;  %v963_v24 = vrot.slane %v960_v10, 4 }
 0x1c7   : > { %v964_v25 = vadd.f32 %v963_v24, %v960_v10 }
 0x1c9   : > { %v965_v26 = vrot.slane %v964_v25, 2 }
 0x1cb   : > { %v966_v28 = vadd.f32 %v965_v26, %v964_v25 }
 0x1cd   : > { %v967_v31 = vrot.slane %v966_v28, 1 }
 0x1cf   : > { %v968_v33 = vadd.f32 %v967_v31, %v966_v28 }
 0x1d1   : > { %vm993_vm2 = vcmp.eq.f32.partialorder %v968_v33, inf  ;;  %vm995_vm3 = vcmp.eq.f32.partialorder %v968_v33, 0.0 }
 0x237   : > { %v1006_v55 = vpop.permute.xlu0 %1005 }
 0x238   : > { %v1008_v56 = vsel %vm957_vm6, %v1006_v55, 0.0 }
 0x239   : > { %v1009_v57 = vsel %vm959_vm7, %v1008_v56, 0.0 }
 0x23a   : > { %v1012_v58 = vrot.slane %v1009_v57, 4  ;;  %1010 = vadd.xlane.f32.xlu0 %v1009_v57 }
 0x23c   : > { %v1013_v59 = vadd.f32 %v1012_v58, %v1009_v57 }
 0x23e   : > { %v1014_v60 = vrot.slane %v1013_v59, 2 }
 0x240   : > { %v1015_v61 = vadd.f32 %v1014_v60, %v1013_v59 }
 0x242   : > { %v1016_v62 = vrot.slane %v1015_v61, 1 }
 0x244   : > { %v1017_v63 = vadd.f32 %v1016_v62, %v1015_v61  ;;  %v996_v61 = vand.u32 2147483648, %v968_v33 }
 0x246   : > { %1628 = vrsqrt.f32 %v1017_v63  ;;  %vm1046_vm8 = vcmp.eq.f32.partialorder %v1017_v63, inf  ;;  %v1049_v4 = vand.u32 2147483648, %v1017_v63  ;;  %vm1048_vm9 = vcmp.eq.f32.partialorder %v1017_v63, 0.0 }
 0x250   : > { %v1629_v2 = vpop.eup %1628  ;;  %1021 = vrot.lane.b32.xlu0 %v1020_v1, %s2003_s19 }
 0x251   : > { %v1045_v3 = vmul.f32 %v1629_v2, %v1017_v63 }
 0x253   : > { %v1047_v5 = vsel %vm1046_vm8, %v1017_v63, %v1045_v3 }
 0x254   : > { %v1050_v6 = vsel %vm1048_vm9, %v1049_v4, %v1047_v5 }
 0x255   : > { %v1051_v7 = vmax.f32 %v1050_v6, 1e-12 }
 0x257   : > { %1630 = vrcp.f32 %v1051_v7 }
 0x261   : > { %v1631_v8 = vpop.eup %1630 }
 0x262   : > { %1059 = vrot.lane.b32.xlu1 %v1631_v8, %s2004_s27 }
 0x286   : > { %961 = vadd.xlane.f32.xlu1 %v960_v10 }
 0x2c7   : > { %v1011_v11 = vpop.xlane.xlu0 %1010 }
 0x2c8   : > { %1632 = vrsqrt.f32 %v1011_v11  ;;  %vm1036_vm10 = vcmp.eq.f32.partialorder %v1011_v11, inf  ;;  %v1039_v14 = vand.u32 2147483648, %v1011_v11  ;;  %vm1038_vm11 = vcmp.eq.f32.partialorder %v1011_v11, 0.0 }
 0x2c9   : > { %v1018_v29 = vadd.f32 %v1017_v63, %v1011_v11 }
 0x2cb   : > { %v1022_v27 = vpop.permute.xlu0 %1021 }
 0x2cc   : > { %v1024_v30 = vsub.f32 %v1018_v29, %v1022_v27 }
 0x2ce   : > { %v1025_v32 = vmax.f32 %v1024_v30, 0.0 }
 0x2d0   : > { %v1026_v34 = vadd.f32 1e-08, %v1025_v32 }
 0x2d2   : > { %v1633_v12 = vpop.eup %1632  ;;  %vm1029_vm13 = vcmp.eq.f32.partialorder %v1026_v34, inf  ;;  %v1032_v46 = vand.u32 2147483648, %v1026_v34  ;;  %vm1031_vm15 = vcmp.eq.f32.partialorder %v1026_v34, 0.0 }
 0x2d3   : > { %v1035_v13 = vmul.f32 %v1633_v12, %v1011_v11 }
 0x2d4   : > { %v1060_v21 = vpop.permute.xlu1 %1059 }
 0x2d5   : > { %v1037_v15 = vsel %vm1036_vm10, %v1011_v11, %v1035_v13 }
 0x2d6   : > { %v1040_v16 = vsel %vm1038_vm11, %v1039_v14, %v1037_v15 }
 0x2d7   : > { %v1041_v17 = vmax.f32 %v1040_v16, 1e-12 }
 0x2d9   : > { %1634 = vrcp.f32 %v1041_v17 }
 0x2da   : > { %1636 = vrsqrt.f32 %v1026_v34 }
 0x2e3   : > { %v1635_v18 = vpop.eup %1634 }
 0x2e4   : > { %v1055_v19 = vrot.slane %v1635_v18, 4  ;;  %v1637_v40 = vpop.eup %1636 }
 0x2e5   : > { %v1028_v41 = vmul.f32 %v1637_v40, %v1026_v34 }
 0x2e6   : > { %v1057_v20 = vmul.f32 %v1055_v19, %v2374_v50 }
 0x2e7   : > { %v1030_v45 = vsel %vm1029_vm13, %v1026_v34, %v1028_v41 }
 0x2e8   : > { %v1062_v22 = vmul.f32 %v1060_v21, %v1057_v20  ;;  %v1033_v49 = vsel %vm1031_vm15, %v1032_v46, %v1030_v45 }
 0x2ea   : > { %v1065_v23 = vrot.slane %v1062_v22, 4 }
 0x2ec   : > { %1066 = vrot.lane.b32.xlu1 %v1065_v23, %s2003_s19 }
 0x313   : > { %v962_v35 = vpop.xlane.xlu1 %961 }
 0x314   : > { %v969_v36 = vadd.f32 %v968_v33, %v962_v35  ;;  %vm983_vm0 = vcmp.eq.f32.partialorder %v962_v35, inf  ;;  %v986_v57 = vand.u32 2147483648, %v962_v35  ;;  %vm985_vm1 = vcmp.eq.f32.partialorder %v962_v35, 0.0 }
 0x316   : > { %v971_v37 = vsub.f32 %v969_v36, %v970_v0 }
 0x318   : > { %v972_v38 = vmax.f32 %v971_v37, 0.0 }
 0x31a   : > { %v973_v39 = vadd.f32 1e-08, %v972_v38 }
 0x31c   : > { %1638 = vrsqrt.f32 %v973_v39  ;;  %vm976_vm12 = vcmp.eq.f32.partialorder %v973_v39, inf  ;;  %v979_v43 = vand.u32 2147483648, %v973_v39  ;;  %vm978_vm14 = vcmp.eq.f32.partialorder %v973_v39, 0.0 }
 0x31d   : > { %1640 = vrsqrt.f32 %v962_v35 }
 0x31e   : > { %1642 = vrsqrt.f32 %v968_v33 }
 0x326   : > { %v1639_v42 = vpop.eup %1638 }
 0x327   : > { %v975_v44 = vmul.f32 %v1639_v42, %v973_v39  ;;  %v1641_v54 = vpop.eup %1640 }
 0x328   : > { %v982_v55 = vmul.f32 %v1641_v54, %v962_v35  ;;  %v1643_v56 = vpop.eup %1642 }
 0x329   : > { %v977_v47 = vsel %vm976_vm12, %v973_v39, %v975_v44  ;;  %v992_v59 = vmul.f32 %v1643_v56, %v968_v33 }
 0x32a   : > { %v980_v48 = vsel %vm978_vm14, %v979_v43, %v977_v47  ;;  %v984_v58 = vsel %vm983_vm0, %v962_v35, %v982_v55 }
 0x32b   : > { %v1063_v51 = vsub.f32 %v980_v48, %v1033_v49  ;;  %v987_v60 = vsel %vm985_vm1, %v986_v57, %v984_v58  ;;  %v994_v62 = vsel %vm993_vm2, %v968_v33, %v992_v59 }
 0x32c   : > { %v988_v63 = vmax.f32 %v987_v60, 1e-12  ;;  %v997_v0 = vsel %vm995_vm3, %v996_v61, %v994_v62 }
 0x32d   : > { %v1070_v52 = vmul.f32 %v1063_v51, %v1063_v51  ;;  %v998_v1 = vmax.f32 %v997_v0, 1e-12 }
 0x32e   : > { %1644 = vrcp.f32 %v988_v63 }
 0x32f   : > { %v1071_v53 = vsel %vm959_vm7, %v1070_v52, 0.0  ;;  %1646 = vrcp.f32 %v998_v1 }
 0x330   : > { %1072 = vadd.xlane.f32.xlu0 %v1071_v53 }
 0x338   : > { %v1645_v2 = vpop.eup %1644 }
 0x339   : > { %v1001_v3 = vmul.f32 %v1645_v2, %v2374_v50  ;;  %v1647_v4 = vpop.eup %1646 }
 0x33b   : > { %v1002_v5 = vmul.f32 %v1647_v4, %v1001_v3 }
 0x35e   : > { %v1067_v6 = vpop.permute.xlu1 %1066 }
 0x35f   : > { %v1069_v7 = vsub.f32 %v1002_v5, %v1067_v6 }
 0x361   : > { %v1083_v8 = vmul.f32 %v1069_v7, %v1069_v7 }
 0x363   : > { %v1084_v9 = vsel %vm959_vm7, %v1083_v8, 0.0 }
 0x364   : > { %1085 = vadd.xlane.f32.xlu1 %v1084_v9 }
 0x3bd   : > { %v1073_v10 = vpop.xlane.xlu0 %1072 }
 0x3be   : > { %v1074_v11 = vrot.slane %v1073_v10, 4 }
 0x3c0   : > { %v1075_v12 = vadd.f32 %v1074_v11, %v1073_v10 }
 0x3c2   : > { %v1076_v13 = vrot.slane %v1075_v12, 2 }
 0x3c4   : > { %v1077_v14 = vadd.f32 %v1076_v13, %v1075_v12 }
 0x3c6   : > { %v1078_v15 = vrot.slane %v1077_v14, 1 }
 0x3c8   : > { %v1079_v16 = vadd.f32 %v1078_v15, %v1077_v14 }
 0x3ca   : > { %1487 = vpush %v1079_v16 }
 0x3f1   : > { %v1086_v17 = vpop.xlane.xlu1 %1085 }
 0x3f2   : > { %v1087_v50 = vrot.slane %v1086_v17, 4 }
 0x3f4   : > { %v1088_v18 = vadd.f32 %v1087_v50, %v1086_v17 }
 0x3f6   : > { %v1089_v19 = vrot.slane %v1088_v18, 2 }
 0x3f8   : > { %v1090_v20 = vadd.f32 %v1089_v19, %v1088_v18 }
 0x3fa   : > { %v1091_v21 = vrot.slane %v1090_v20, 1 }
 0x3fb   : > { %s1488_s16 = spop %1487 }
 0x3fc   : > { %v1081_v22 = vstv %s1488_s16  ;;  %v1092_v23 = vadd.f32 %v1091_v21, %v1090_v20 }
 0x3fd   : > { %1082 = vst [vmem:[%s453_s21] sm:$0x1] %v1081_v22 }
 0x3fe   : > { %1489 = vpush %v1092_v23 }
 0x42f   : > { %s1490_s23 = spop %1489 }
 0x430   : > { %v1094_v24 = vstv %s1490_s23 }
 0x431   : > { %1095 = vst [vmem:[%s459_s24] sm:$0x1] %v1094_v24 }
 0x432 PF: > { %s1437_s29 = sshll.u32 %s1982_s8, 1  ;;  %s1140_s6 = sshll.u32 %s447_s1, 4  ;;  %s2401_s6 = int_to_ptr.vmem [resolvable:$true] %s1140_s6 }
 0x433   : > { %s2396_s10 = sadd.s32 %s1978_s30, %s1437_s29  ;;  %s2410_s19 = scalar_lea.sflag [#allocation13], %s379_s13 }
 0x434   : > { %s1438_s18 = sshll.u32 %s2396_s10, 6  ;;  %s1768_s30 = scalar_lea.vmem %s2401_s6, 64 }
 0x435   : > { %s1138_s14 = scalar_lea.hbm %s2564_s5, %s1438_s18  ;;  %p1769_p9 = scmp.ne.s32.totalorder %s2401_s6, %s1768_s30 }
 0x436   : > { %p2624_p12 = scmp.ne.s32.totalorder %s2603_s20, 0  ;;  %s2005_s1 = smov [#allocation12]  }
 0x437   : > { %s1772_s27 = sshll.u32 %s2005_s1, 4  ;;  %s1773_s27 = int_to_ptr.vmem [resolvable:$false] %s1772_s27 }
 0x438   : > { %p1770_p4 = pnand %p1769_p9, %p2624_p12  ;;  %s1774_s16 = scalar_lea.vmem %s1773_s27, 128 }
 0x439   : > { %p1775_p1 = scmp.lt.s32.totalorder %s2401_s6, %s1773_s27  ;;  %p1776_p0 = scmp.lt.s32.totalorder %s1774_s16, %s1768_s30 }
 0x43a   : > { %p1771_p3 = pneg %p1770_p4 }
 0x43b   : > { %p1777_p5 = por %p1776_p0, %p1775_p1 }
 0x43d   : > { %p1778_p7 = pnand %p1777_p5, %p1771_p3 }
 0x43f   : > { %1781 = shalt.err (!%p1778_p7)
}
 0x440   : > { %s1782_s23 = scalar_lea.hbm %s1138_s14, 64  ;;  %s1786_s29 = scalar_lea.hbm %s2564_s5, 384 }
 0x441   : > { %p1783_p6 = scmp.ne.s32.totalorder %s1138_s14, %s1782_s23  ;;  %p1787_p10 = scmp.lt.u32.totalorder %s1138_s14, %s2564_s5 }
 0x442   : > { %p1788_p11 = scmp.lt.u32.totalorder %s1786_s29, %s1782_s23  ;;  %p1790_p9 = scmp.lt.u32.totalorder %s1782_s23, %s1138_s14 }
 0x443   : > { %p1784_p13 = pnand %p1783_p6, %p2624_p12 }
 0x444   : > { %p1789_p8 = por %p1788_p11, %p1787_p10 }
 0x445   : > { %p1785_p2 = pneg %p1784_p13 }
 0x446   : > { %p1791_p4 = por %p1790_p9, %p1789_p8 }
 0x448   : > { %p1792_p3 = pnand %p1791_p4, %p1785_p2 }
 0x44a   : > { %1795 = shalt.err (!%p1792_p3)
}
 0x44b   : > { %1500 = dma.vmem_to_hbm [thread:$0]  (%p2624_p12), %s2401_s6, 64, %s1138_s14, %s2410_s19  }
 0x44c   : > { %s2434_s27 = scalar_lea.hbm %s2563_s4, %s1438_s18  ;;  %s1125_s16 = sshll.u32 %s440_s11, 4  ;;  %s2438_s16 = int_to_ptr.vmem [resolvable:$true] %s1125_s16 }
 0x44d   : > { %s1441_s23 = sshll.u32 %s1982_s8, 4  ;;  %s1097_s12 = scalar_lea.sflag [#allocation5], %s2326_s26 }
 0x44e   : > { %s1796_s13 = scalar_lea.vmem %s2438_s16, 64  ;;  %s2006_s10 = smov [#allocation11]  }
 0x44f   : > { %p1797_p1 = scmp.ne.s32.totalorder %s2438_s16, %s1796_s13  ;;  %s1800_s6 = sshll.u32 %s2006_s10, 4  ;;  %s1801_s6 = int_to_ptr.vmem [resolvable:$false] %s1800_s6 }
 0x450   : > { %s1802_s14 = scalar_lea.vmem %s1801_s6, 128  ;;  %p1803_p7 = scmp.lt.s32.totalorder %s2438_s16, %s1801_s6 }
 0x451   : > { %p1798_p0 = pnand %p1797_p1, %p2624_p12  ;;  %p1804_p6 = scmp.lt.s32.totalorder %s1802_s14, %s1796_s13 }
 0x453   : > { %p1799_p5 = pneg %p1798_p0  ;;  %p1805_p13 = por %p1804_p6, %p1803_p7 }
 0x455   : > { %p1806_p2 = pnand %p1805_p13, %p1799_p5 }
 0x457   : > { %1809 = shalt.err (!%p1806_p2)
}
 0x458   : > { %s1810_s26 = scalar_lea.hbm %s2434_s27, 64  ;;  %s1814_s18 = scalar_lea.hbm %s2563_s4, 384 }
 0x459   : > { %p1811_p10 = scmp.ne.s32.totalorder %s2434_s27, %s1810_s26  ;;  %p1815_p9 = scmp.lt.u32.totalorder %s2434_s27, %s2563_s4 }
 0x45a   : > { %p1816_p4 = scmp.lt.u32.totalorder %s1814_s18, %s1810_s26  ;;  %p1818_p1 = scmp.lt.u32.totalorder %s1810_s26, %s2434_s27 }
 0x45b   : > { %p1812_p11 = pnand %p1811_p10, %p2624_p12 }
 0x45c   : > { %p1817_p3 = por %p1816_p4, %p1815_p9 }
 0x45d   : > { %p1813_p8 = pneg %p1812_p11 }
 0x45e   : > { %p1819_p0 = por %p1818_p1, %p1817_p3 }
 0x460   : > { %p1820_p5 = pnand %p1819_p0, %p1813_p8 }
 0x462   : > { %1823 = shalt.err (!%p1820_p5)
}
 0x463   : > { %1499 = dma.vmem_to_hbm [thread:$0]  (%p2624_p12), %s2438_s16, 64, %s2434_s27, %s1097_s12  }
 0x464   : > { %s2625_s1 = sld [smem:[#allocation38_spill]]  ;;  %s1153_s10 = sshll.u32 %s453_s21, 4  ;;  %s1154_s10 = int_to_ptr.vmem [resolvable:$true] %s1153_s10 }
 0x465   : > { %s1824_s6 = scalar_lea.vmem %s1154_s10, 16  ;;  %p2626_p6 = scmp.ne.s32.totalorder %s2608_s15, 0 }
 0x466   : > { %p1825_p7 = scmp.ne.s32.totalorder %s1154_s10, %s1824_s6  ;;  %s2007_s20 = smov [#allocation14]  }
 0x467   : > { %s1828_s14 = sshll.u32 %s2007_s20, 4  ;;  %s1829_s14 = int_to_ptr.vmem [resolvable:$false] %s1828_s14 }
 0x468   : > { %p1826_p13 = pnand %p1825_p7, %p2626_p6  ;;  %s1830_s26 = scalar_lea.vmem %s1829_s14, 32 }
 0x469   : > { %p1831_p10 = scmp.lt.s32.totalorder %s1154_s10, %s1829_s14  ;;  %p1832_p12 = scmp.lt.s32.totalorder %s1830_s26, %s1824_s6 }
 0x46a   : > { %s2468_s13 = scalar_lea.hbm %s2625_s1, %s1441_s23  ;;  %p1827_p2 = pneg %p1826_p13 }
 0x46b   : > { %p1833_p11 = por %p1832_p12, %p1831_p10 }
 0x46d   : > { %p1834_p8 = pnand %p1833_p11, %p1827_p2 }
 0x46f   : > { %1837 = shalt.err (!%p1834_p8)
}
 0x470   : > { %s1838_s21 = scalar_lea.hbm %s2468_s13, 16  ;;  %s1842_s12 = scalar_lea.hbm %s2625_s1, 48 }
 0x471   : > { %p1839_p9 = scmp.ne.s32.totalorder %s2468_s13, %s1838_s21  ;;  %p1843_p1 = scmp.lt.u32.totalorder %s2468_s13, %s2625_s1 }
 0x472   : > { %p1844_p0 = scmp.lt.u32.totalorder %s1842_s12, %s1838_s21  ;;  %p1846_p7 = scmp.lt.u32.totalorder %s1838_s21, %s2468_s13 }
 0x473   : > { %p1840_p4 = pnand %p1839_p9, %p2626_p6 }
 0x474   : > { %p1845_p5 = por %p1844_p0, %p1843_p1 }
 0x475   : > { %p1841_p3 = pneg %p1840_p4 }
 0x476   : > { %p1847_p13 = por %p1846_p7, %p1845_p5 }
 0x478   : > { %p1848_p2 = pnand %p1847_p13, %p1841_p3 }
 0x47a   : > { %1851 = shalt.err (!%p1848_p2)
}
 0x47b   : > { %1501 = dma.vmem_to_hbm [thread:$0]  (%p2626_p6), %s1154_s10, 16, %s2468_s13, %s2410_s19  }
 0x47c   : > { %s2627_s17 = sld [smem:[#allocation39_spill]]  ;;  %s1166_s30 = sshll.u32 %s459_s24, 4  ;;  %s1167_s30 = int_to_ptr.vmem [resolvable:$true] %s1166_s30 }
 0x47d   : > { %s1111_s6 = scalar_lea.sflag [#allocation16], %s2352_s7  ;;  %s1852_s20 = scalar_lea.vmem %s1167_s30, 16 }
 0x47e   : > { %p1853_p10 = scmp.ne.s32.totalorder %s1167_s30, %s1852_s20  ;;  %s2008_s14 = smov [#allocation15]  }
 0x47f   : > { %s1856_s26 = sshll.u32 %s2008_s14, 4  ;;  %s1857_s26 = int_to_ptr.vmem [resolvable:$false] %s1856_s26 }
 0x480   : > { %p1854_p12 = pnand %p1853_p10, %p2626_p6  ;;  %s1858_s21 = scalar_lea.vmem %s1857_s26, 32 }
 0x481   : > { %p1859_p8 = scmp.lt.s32.totalorder %s1167_s30, %s1857_s26  ;;  %p1860_p9 = scmp.lt.s32.totalorder %s1858_s21, %s1852_s20 }
 0x482   : > { %s2495_s9 = scalar_lea.hbm %s2627_s17, %s1441_s23  ;;  %p1855_p11 = pneg %p1854_p12 }
 0x483   : > { %p1861_p4 = por %p1860_p9, %p1859_p8 }
 0x485   : > { %p1862_p3 = pnand %p1861_p4, %p1855_p11 }
 0x487   : > { %1865 = shalt.err (!%p1862_p3)
}
 0x488   : > { %s1866_s8 = scalar_lea.hbm %s2495_s9, 16  ;;  %s1870_s19 = scalar_lea.hbm %s2627_s17, 48 }
 0x489   : > { %p1867_p1 = scmp.ne.s32.totalorder %s2495_s9, %s1866_s8  ;;  %p1871_p7 = scmp.lt.u32.totalorder %s2495_s9, %s2627_s17 }
 0x48a   : > { %p1872_p13 = scmp.lt.u32.totalorder %s1870_s19, %s1866_s8  ;;  %p1874_p10 = scmp.lt.u32.totalorder %s1866_s8, %s2495_s9 }
 0x48b   : > { %p1868_p0 = pnand %p1867_p1, %p2626_p6 }
 0x48c   : > { %p1873_p2 = por %p1872_p13, %p1871_p7 }
 0x48d   : > { %p1869_p5 = pneg %p1868_p0 }
 0x48e   : > { %p1875_p12 = por %p1874_p10, %p1873_p2 }
 0x490   : > { %p1876_p11 = pnand %p1875_p12, %p1869_p5 }
 0x492   : > { %1879 = shalt.err (!%p1876_p11)
}
 0x493   : > { %1502 = dma.vmem_to_hbm [thread:$0]  (%p2626_p6), %s1167_s30, 16, %s2495_s9, %s1111_s6  }
 0x494 PF: > { %s2628_s10 = sld [smem:[#allocation30_spill]]  ;;  %s2629_s27 = sld [smem:[#allocation26_spill]] }
 0x495   : > { %s2630_s16 = sld [smem:[#allocation33_spill]] }
 0x49a   : > { %p1534_p8 = scmp.ge.s32.totalorder %s2628_s10, 2  ;;  %s1178_s12 = sand.u32 1, %s2629_s27  }
 0x49b   : > { %p2631_p9 = scmp.ne.s32.totalorder %s2630_s16, 0  ;;  %s1179_s22 = scalar_lea.sflag [#allocation5], %s1178_s12 }
 0x49d   : > { %p1521_p4 = pnand %p1534_p8, %p2631_p9 }
 0x49f   : > { %1937 = dma.done.wait (!%p1521_p4), %s1179_s22, 64  }
 0x4a0   : > { %1939 = vsyncadd (!%p1521_p4), %s1179_s22, 4294967232  ;;  %s2632_s11 = sadd.s32 4294967294, %s2628_s10  }
 0x4a1   : > { %s1187_s18 = sand.u32 1, %s2632_s11  }
 0x4a2   : > { %s1188_s29 = scalar_lea.sflag [#allocation13], %s1187_s18 }
 0x4a3   : > { %1941 = dma.done.wait (!%p1521_p4), %s1188_s29, 64  }
 0x4a4   : > { %1943 = vsyncadd (!%p1521_p4), %s1188_s29, 4294967232  ;;  %s2633_s15 = sld [smem:[#allocation36_spill]] }
 0x4aa   : > { %p2634_p3 = scmp.ne.s32.totalorder %s2633_s15, 0 }
 0x4ac   : > { %p1527_p6 = pnand %p1534_p8, %p2634_p3 }
 0x4ae   : > { %1945 = dma.done.wait (!%p1527_p6), %s1188_s29, 16  }
 0x4af   : > { %1947 = vsyncadd (!%p1527_p6), %s1188_s29, 4294967280  ;;  %s2635_s9 = sld [smem:[#allocation24_spill]] }
 0x4b5   : > { %s1204_s30 = sand.u32 1, %s2635_s9  }
 0x4b6   : > { %s1205_s6 = scalar_lea.sflag [#allocation16], %s1204_s30 }
 0x4b7   : > { %1949 = dma.done.wait (!%p1527_p6), %s1205_s6, 16  }
 0x4b8   : > { %1951 = vsyncadd (!%p1527_p6), %s1205_s6, 4294967280  ;;  %s36_s11 = sadd.s32 1, %s2628_s10   ;;  %s2636_s20 = sld [smem:[#allocation25_spill]] }
 0x4b9   : > { %p33_p1 = scmp.ge.s32.totalorder %s36_s11, 8   ;;  %s2637_s26 = sld [smem:[#allocation35_spill]] }
 0x4ba   : > { %s2638_s14 = sld [smem:[#allocation27_spill]]  ;;  %s2639_s29 = sld [smem:[#allocation34_spill]] }
 0x4bb   : > { %s2640_s30 = sld [smem:[#allocation28_spill]]  ;;  %s2641_s8 = sld [smem:[#allocation29_spill]] }
 0x4bc   : > { %s2642_s9 = sld [smem:[#allocation31_spill]]  ;;  %s2643_s10 = sld [smem:[#allocation32_spill]] }
 0x4bd   : > { %s2644_s24 = smov %s1958_s25  ;;  %s2646_s27 = smov %s1970_s28 }
 0x4be   : > { %s2645_s25 = smov %s2636_s20  ;;  %35 = sbr.rel (!%p33_p1) target bundleno = 21 (0x15), region = 175 }
 0x4c0   : > { %s2647_s28 = smov %s2638_s14 }
 0x4c5   :  { %1209 = vsyncpa [#allocation4], 1 }
 0x4c6   :  { %1211 = vsyncpa [#allocation4 + $0x1], 1 }
 0x4c7   :  { %1212 = vsyncpa [#allocation7], 1 }
 0x4c8   :  { %1214 = vsyncpa [#allocation7 + $0x1], 1 }
 0x4c9   :  { %1215 = vsyncpa [#allocation10], 1 }
 0x4ca   :  { %1217 = vsyncpa [#allocation10 + $0x1], 1 }
 0x4cb   :  { %1218 = vsyncpa [#allocation5], 1 }
 0x4cc   :  { %1220 = vsyncpa [#allocation5 + $0x1], 1 }
 0x4cd   :  { %1221 = vsyncpa [#allocation13], 1 }
 0x4ce   :  { %1223 = vsyncpa [#allocation13 + $0x1], 1 }
 0x4cf   :  { %1224 = vsyncpa [#allocation16], 1 }
 0x4d0   :  { %1226 = vsyncpa [#allocation16 + $0x1], 1 }

</bundles_post_ra>
